<compile_context>
chip_gen: v7x
topology: tpu7x:2x2x1
jax: 0.10.0
libtpu: 0.0.40
codegen_flags: <defaults>
</compile_context>

<pallas_src>
import jax
import jax.numpy as jnp
from jax import lax
from jax.experimental import pallas as pl
from jax.experimental.pallas import tpu as pltpu

# Scoped VMEM budget: >= v5e default (16 MiB), == v6e/v7x default, well under v7x's 64 MiB cap.
# (On v6e this can be raised to 64-96 MiB together with larger kv tiles if DMA is exposed.)
_VMEM_LIMIT = 32 * 1024 * 1024


# ---------------------------------------------------------------------------
# Row-tiled linear with a single (possibly concatenated) lane-dense output.
# ---------------------------------------------------------------------------
def _linear_kernel(x_ref, w_ref, o_ref):
    y = jnp.dot(x_ref[...], w_ref[...], preferred_element_type=jnp.float32)
    o_ref[...] = y.astype(o_ref.dtype)


def _linear_bias_kernel(x_ref, w_ref, b_ref, o_ref):
    y = jnp.dot(x_ref[...], w_ref[...], preferred_element_type=jnp.float32)
    y = y + b_ref[...].astype(jnp.float32)
    o_ref[...] = y.astype(o_ref.dtype)


def pallas_linear(x, w, bias=None, *, out_dtype=None, block_rows=1024):
    """x: (B, N, Cin); w: (Cin, Cout) (pre-transposed / pre-concatenated); bias: (Cout,) or None.

    Row-tiled over the flattened (B*N) axis; the weight (and bias) stay resident in VMEM.
    Returns (B, N, Cout).
    """
    B, N, Cin = x.shape
    Cout = w.shape[1]
    out_dtype = x.dtype if out_dtype is None else out_dtype
    R = B * N
    x2 = x.reshape(R, Cin)                               # contiguous reshape: no HBM copy
    if R <= block_rows:
        tm = R                                           # full extent -> always legal
    else:
        tm = max(8, (block_rows // 8) * 8)               # second-minor dim multiple of 8
    grid = (pl.cdiv(R, tm),)

    in_specs = [pl.BlockSpec((tm, Cin), lambda i: (i, 0)),
                pl.BlockSpec(w.shape, lambda i: (0, 0))]         # weight resident
    args = [x2, w]
    if bias is not None:
        b2 = bias.reshape(1, -1)
        in_specs.append(pl.BlockSpec(b2.shape, lambda i: (0, 0)))  # bias resident
        args.append(b2)
        kernel = _linear_bias_kernel
    else:
        kernel = _linear_kernel

    out = pl.pallas_call(
        kernel,
        out_shape=jax.ShapeDtypeStruct((R, Cout), out_dtype),
        grid=grid,
        in_specs=in_specs,
        out_specs=pl.BlockSpec((tm, Cout), lambda i: (i, 0)),
        compiler_params=pltpu.CompilerParams(
            dimension_semantics=("parallel",),
            vmem_limit_bytes=_VMEM_LIMIT),
    )(*args)
    return out.reshape(B, N, Cout)


# ---------------------------------------------------------------------------
# Flash-style multi-head attention; heads sliced from lane-dense column slabs.
# ---------------------------------------------------------------------------
def _make_attention_kernel(*, heads, dim_head, q_off, k_off, v_off, enhance,
                           kv_tail, kv_len, block_kv):
    def kernel(*refs):
        if enhance:
            (qsrc_ref, kvsrc_ref, xq_ref, xk_ref, o_ref,
             m_scr, l_scr, acc_scr, xqn_scr) = refs
        else:
            qsrc_ref, kvsrc_ref, o_ref, m_scr, l_scr, acc_scr = refs

        ki = pl.program_id(2)

        @pl.when(ki == 0)
        def _init():
            m_scr[...] = jnp.full(m_scr.shape, -jnp.inf, dtype=m_scr.dtype)
            l_scr[...] = jnp.zeros(l_scr.shape, dtype=l_scr.dtype)
            acc_scr[...] = jnp.zeros(acc_scr.shape, dtype=acc_scr.dtype)

        # ---- terms shared by all heads (computed ONCE per (q-tile, kv-tile) step) ----
        bias = None
        if enhance:
            # torch.nn.functional.normalize(x, p=2, dim=-1) with eps=1e-12.
            # xq normalization depends only on the q tile -> hoisted out of the kv loop.
            @pl.when(ki == 0)
            def _norm_q():
                xq = xq_ref[0].astype(jnp.float32)                  # (TQ, C)
                xqn_scr[...] = xq * lax.rsqrt(
                    jnp.maximum(jnp.sum(xq * xq, axis=-1, keepdims=True), 1e-24))

            xk = xk_ref[0].astype(jnp.float32)                      # (TK, C)
            xkn = xk * lax.rsqrt(
                jnp.maximum(jnp.sum(xk * xk, axis=-1, keepdims=True), 1e-24))
            cos = lax.dot_general(xqn_scr[...], xkn, (((1,), (1,)), ((), ())),
                                  preferred_element_type=jnp.float32)   # (TQ, TK)
            bias = jnp.where(cos > 0.0, 0.0, -1e9)

        if kv_tail:
            col_ids = ki * block_kv + lax.broadcasted_iota(jnp.int32, (1, block_kv), 1)
            col_valid = col_ids < kv_len                             # (1, TK)
            row_ids = ki * block_kv + lax.broadcasted_iota(jnp.int32, (block_kv, 1), 0)
            row_valid = row_ids < kv_len                             # (TK, 1)

        # ---- per-head online softmax; scores are lane-dense (TQ, TK) f32 ----
        # NOTE: `scale` is folded into the q projection weight, so no `* scale` here.
        for h in range(heads):
            lo = h * dim_head
            hi = lo + dim_head
            qh = qsrc_ref[0, :, q_off + lo:q_off + hi]               # (TQ, dh)
            kh = kvsrc_ref[0, :, k_off + lo:k_off + hi]              # (TK, dh)
            vh = kvsrc_ref[0, :, v_off + lo:v_off + hi]              # (TK, dh)

            s = lax.dot_general(qh, kh, (((1,), (1,)), ((), ())),
                                preferred_element_type=jnp.float32)  # (TQ, TK)
            if bias is not None:
                s = s + bias
            if kv_tail:
                # Order is load-bearing: col mask AFTER bias (kills NaN from OOB xk/k tails),
                # and V-row zeroing guards p@v against Inf/NaN in OOB v tails.
                s = jnp.where(col_valid, s, -1e30)
                vh = jnp.where(row_valid, vh, jnp.zeros_like(vh))

            m_prev = m_scr[:, h:h + 1]                               # (TQ, 1)
            m_cur = jnp.maximum(m_prev, jnp.max(s, axis=-1, keepdims=True))
            alpha = jnp.exp(m_prev - m_cur)
            p = jnp.exp(s - m_cur)
            l_scr[:, h:h + 1] = alpha * l_scr[:, h:h + 1] + jnp.sum(p, axis=-1, keepdims=True)
            pv = jnp.dot(p.astype(vh.dtype), vh, preferred_element_type=jnp.float32)
            acc_scr[:, lo:hi] = alpha * acc_scr[:, lo:hi] + pv
            m_scr[:, h:h + 1] = m_cur

        @pl.when(ki == pl.num_programs(2) - 1)
        def _finalize():
            # Normalize each head's columns in place, then ONE lane-dense (TQ, H*dh) store.
            for h in range(heads):
                lo = h * dim_head
                hi = lo + dim_head
                acc_scr[:, lo:hi] = acc_scr[:, lo:hi] * pl.reciprocal(
                    l_scr[:, h:h + 1], approx=False)
            o_ref[0] = acc_scr[...].astype(o_ref.dtype)

    return kernel


def pallas_attention(qsrc, kvsrc, x, *, heads, dim_head, q_off, k_off, v_off,
                     enhance, block_q=256, block_kv=128, out_dtype=None):
    """qsrc: (B, N, Wq) holding q columns at [q_off, q_off+H*dh);
    kvsrc: (B, M, Wkv) holding k at [k_off, ...) and v at [v_off, ...);
    x: (B, N, C), only read when `enhance` (self-attention)."""
    B, N, Wq = qsrc.shape
    M, Wkv = kvsrc.shape[1], kvsrc.shape[2]
    C = x.shape[2]
    inner = heads * dim_head
    out_dtype = qsrc.dtype if out_dtype is None else out_dtype

    tq = N if N <= block_q else max(8, (block_q // 8) * 8)
    tk = M if M <= block_kv else max(8, (block_kv // 8) * 8)
    grid = (B, pl.cdiv(N, tq), pl.cdiv(M, tk))
    kv_tail = (M % tk) != 0

    in_specs = [
        pl.BlockSpec((1, tq, Wq), lambda b, qi, ki: (b, qi, 0)),
        pl.BlockSpec((1, tk, Wkv), lambda b, qi, ki: (b, ki, 0)),
    ]
    args = [qsrc, kvsrc]
    if enhance:
        in_specs += [
            pl.BlockSpec((1, tq, C), lambda b, qi, ki: (b, qi, 0)),
            pl.BlockSpec((1, tk, C), lambda b, qi, ki: (b, ki, 0)),
        ]
        args += [x, x]

    scratch_shapes = [
        pltpu.VMEM((tq, heads), jnp.float32),            # running max, lane-dense per head
        pltpu.VMEM((tq, heads), jnp.float32),            # running denom, lane-dense per head
        pltpu.VMEM((tq, inner), jnp.float32),            # single lane-dense output accumulator
    ]
    if enhance:
        scratch_shapes.append(pltpu.VMEM((tq, C), jnp.float32))   # normalized xq (per q tile)

    kernel = _make_attention_kernel(
        heads=heads, dim_head=dim_head, q_off=q_off, k_off=k_off, v_off=v_off,
        enhance=enhance, kv_tail=kv_tail, kv_len=M, block_kv=tk)

    return pl.pallas_call(
        kernel,
        out_shape=jax.ShapeDtypeStruct((B, N, inner), out_dtype),
        grid=grid,
        in_specs=in_specs,
        out_specs=pl.BlockSpec((1, tq, inner), lambda b, qi, ki: (b, qi, 0)),
        scratch_shapes=scratch_shapes,
        compiler_params=pltpu.CompilerParams(
            dimension_semantics=("parallel", "parallel", "arbitrary"),
            vmem_limit_bytes=_VMEM_LIMIT),
    )(*args)


# ---------------------------------------------------------------------------
# Module-level forward
# ---------------------------------------------------------------------------
def spatial_temporal_attention(x, params, *, heads, dim_head, context=None,
                               enhance_multi_view_correspondence=False,
                               block_q=256, block_kv=128, block_rows=1024,
                               attn_dtype=None):
    """attn_dtype: dtype for q/k/v (and x fed to the cosine bias); bf16 recommended on v6e/v7x.
    Accumulation and softmax statistics are always f32."""
    inner = heads * dim_head
    scale = dim_head ** -0.5
    attn_dtype = x.dtype if attn_dtype is None else attn_dtype

    if context is None:
        # Fused q/k/v projection: ONE dot with a concatenated weight (scale folded into wq),
        # one lane-dense (rows, 3*inner) output slab.
        w_qkv = jnp.concatenate(
            [params["wq_t"] * scale, params["wk_t"], params["wv_t"]], axis=1)
        qkv = pallas_linear(x, w_qkv, out_dtype=attn_dtype, block_rows=block_rows)
        qsrc, kvsrc = qkv, qkv
        q_off, k_off, v_off = 0, inner, 2 * inner
    else:
        # TODO(synk): the cosine-similarity bias is (N, N) built from x and only makes sense for
        # self-attention; the original module would also shape-mismatch for cross-attention.
        assert not enhance_multi_view_correspondence, (
            "enhance_multi_view_correspondence requires context is None (self-attention)")
        qsrc = pallas_linear(x, params["wq_t"] * scale,
                             out_dtype=attn_dtype, block_rows=block_rows)
        w_kv = jnp.concatenate([params["wk_t"], params["wv_t"]], axis=1)
        kvsrc = pallas_linear(context, w_kv, out_dtype=attn_dtype, block_rows=block_rows)
        q_off, k_off, v_off = 0, 0, inner

    xb = x
    if enhance_multi_view_correspondence and x.dtype != attn_dtype:
        xb = x.astype(attn_dtype)

    out = pallas_attention(qsrc, kvsrc, xb, heads=heads, dim_head=dim_head,
                           q_off=q_off, k_off=k_off, v_off=v_off,
                           enhance=enhance_multi_view_correspondence,
                           block_q=block_q, block_kv=block_kv,
                           out_dtype=attn_dtype)                    # (B, N, H*dh)

    # to_out = Linear(inner, query_dim) + Dropout(p); dropout is identity in eval.
    return pallas_linear(out, params["wo_t"], bias=params["bo"],
                         out_dtype=x.dtype, block_rows=block_rows)


# ---------------------------------------------------------------------------
# Pure-JAX reference (for correctness check)
# ---------------------------------------------------------------------------
def reference_forward(x, params, *, heads, dim_head, enhance):
    B, N, _ = x.shape
    q = x @ params["wq_t"]
    k = x @ params["wk_t"]
    v = x @ params["wv_t"]

    def split(t):
        return (t.reshape(B, N, heads, dim_head).transpose(0, 2, 1, 3)
                 .reshape(B * heads, N, dim_head))

    qh, kh, vh = map(split, (q, k, v))
    scale = 1.0 / (dim_head ** 0.5)
    s = jnp.einsum("bnd,bmd->bnm", qh, kh) * scale
    if enhance:
        nrm = jnp.sqrt(jnp.sum(x * x, axis=-1, keepdims=True))
        xn = x / jnp.maximum(nrm, 1e-12)
        cos = jnp.einsum("bnc,bmc->bnm", xn, xn)
        bias = jnp.where(cos > 0.0, 0.0, -1e9)
        bias = jnp.repeat(bias, heads, axis=0)
        s = s + bias
    p = jax.nn.softmax(s, axis=-1)
    out = jnp.einsum("bnm,bmd->bnd", p, vh)
    out = (out.reshape(B, heads, N, dim_head).transpose(0, 2, 1, 3)
              .reshape(B, N, heads * dim_head))
    return out @ params["wo_t"] + params["bo"]


if __name__ == "__main__":
    # Small shapes consistent with the module: query_dim=32, heads=4, dim_head=8 -> inner=32.
    query_dim, heads, dim_head = 32, 4, 8
    inner_dim = heads * dim_head

    key = jax.random.PRNGKey(0)
    kq, kk, kv, ko, kb, kx1, kx2 = jax.random.split(key, 7)
    params = {
        # PyTorch Linear stores (out, in); we store the transpose (in, out).
        "wq_t": 0.05 * jax.random.normal(kq, (query_dim, inner_dim), jnp.float32),
        "wk_t": 0.05 * jax.random.normal(kk, (query_dim, inner_dim), jnp.float32),
        "wv_t": 0.05 * jax.random.normal(kv, (query_dim, inner_dim), jnp.float32),
        "wo_t": 0.05 * jax.random.normal(ko, (inner_dim, query_dim), jnp.float32),
        "bo": 0.05 * jax.random.normal(kb, (query_dim,), jnp.float32),
    }

    x1 = jax.random.normal(kx1, (2, 16, query_dim), jnp.float32)
    x2 = jax.random.normal(kx2, (2, 24, query_dim), jnp.float32)

    # Case 1: single-tile path. Case 2: multi-tile flash path + ragged KV tail (24 rows, 16-blocks).
    cases = [
        (x1, 256, 256),
        (x2, 16, 16),
    ]

    for x, bq, bkv in cases:
        for enhance in (False, True):
            y = spatial_temporal_attention(
                x, params, heads=heads, dim_head=dim_head,
                enhance_multi_view_correspondence=enhance,
                block_q=bq, block_kv=bkv)
            y = jax.block_until_ready(y)
            y_ref = reference_forward(x, params, heads=heads, dim_head=dim_head,
                                      enhance=enhance)
            assert y.shape == x.shape[:2] + (query_dim,)
            err = jnp.max(jnp.abs(y - y_ref))
            assert jnp.allclose(y, y_ref, rtol=2e-3, atol=2e-3), (
                f"mismatch (N={x.shape[1]}, enhance={enhance}): {err}")

    # bf16 attention operands (v6e/v7x fast path); f32 accumulation / stats keep accuracy.
    y_bf16 = spatial_temporal_attention(
        x1, params, heads=heads, dim_head=dim_head,
        enhance_multi_view_correspondence=False,
        block_q=256, block_kv=256, attn_dtype=jnp.bfloat16)
    y_bf16 = jax.block_until_ready(y_bf16)
    y_ref = reference_forward(x1, params, heads=heads, dim_head=dim_head, enhance=False)
    err = jnp.max(jnp.abs(y_bf16.astype(jnp.float32) - y_ref))
    assert jnp.allclose(y_bf16.astype(jnp.float32), y_ref, rtol=3e-2, atol=3e-2), (
        f"bf16 mismatch: {err}")

    print("KERNEL_OK")
</pallas_src>

<mosaic_0001>
module attributes {stable_mosaic.version = 11 : i64} {
  func.func @_linear_kernel(%arg0: i32, %arg1: memref<32x32xf32, #tpu.memory_space<vmem>>, %arg2: memref<32x96xf32, #tpu.memory_space<vmem>>, %arg3: memref<32x96xf32, #tpu.memory_space<vmem>>) attributes {dimension_semantics = [#tpu.dimension_semantics<parallel>], iteration_bounds = array<i64: 1>, scalar_prefetch = 0 : i64, scratch_operands = 0 : i64, tpu.core_type = #tpu.core_type<tc>, window_params = [{transform_indices = @transform_0, window_bounds = array<i64: 32, 32>}, {pipeline_mode = #tpu.pipeline_mode<synchronous>, transform_indices = @transform_1, window_bounds = array<i64: 32, 96>}, {transform_indices = @transform_2, window_bounds = array<i64: 32, 96>}]} {
    %c0 = arith.constant 0 : index
    %c0_0 = arith.constant 0 : index
    %0 = vector.load %arg1[%c0, %c0_0] : memref<32x32xf32, #tpu.memory_space<vmem>>, vector<32x32xf32>
    %c0_1 = arith.constant 0 : index
    %c0_2 = arith.constant 0 : index
    %1 = vector.load %arg2[%c0_1, %c0_2] : memref<32x96xf32, #tpu.memory_space<vmem>>, vector<32x96xf32>
    %cst = arith.constant dense<0.000000e+00> : vector<32x96xf32>
    %2 = tpu.matmul %0, %1, %cst {dimension_numbers = #tpu.dot_dimension_numbers<[1], [0], [0], [1], [0, 0, 1, 1], [], []>} : vector<32x32xf32>, vector<32x96xf32>, vector<32x96xf32> -> vector<32x96xf32>
    %c0_3 = arith.constant 0 : index
    %c0_4 = arith.constant 0 : index
    %3 = vector.load %arg3[%c0_3, %c0_4] : memref<32x96xf32, #tpu.memory_space<vmem>>, vector<32x96xf32>
    tpu.vector_store %arg3[%c0_3, %c0_4], %2 {strides = array<i32>} : memref<32x96xf32, #tpu.memory_space<vmem>>, vector<32x96xf32>,
    return
  }
  func.func @transform_0(%arg0: i32) -> (i32, i32) {
    %c0_i32 = arith.constant 0 : i32
    %c0_i32_0 = arith.constant 0 : i32
    return %arg0, %c0_i32 : i32, i32
  }
  func.func @transform_1(%arg0: i32) -> (i32, i32) {
    %c0_i32 = arith.constant 0 : i32
    %c0_i32_0 = arith.constant 0 : i32
    %c0_i32_1 = arith.constant 0 : i32
    return %c0_i32, %c0_i32_0 : i32, i32
  }
  func.func @transform_2(%arg0: i32) -> (i32, i32) {
    %c0_i32 = arith.constant 0 : i32
    %c0_i32_0 = arith.constant 0 : i32
    return %arg0, %c0_i32 : i32, i32
  }
}

</mosaic_0001>

<bundles_post_ra>
// kernel: tpu_custom_call.1
= control target key start
LH: loop header
LB: loop body
LE: loop exit
PB: predicated region body
PF: predicated region fallthrough
CT: control target
= control target key end

     0   :  { %7 = vsyncpa [#allocation3], 0  ;;  %s353_s0 = inlined_call_operand.hbm [shape: f32[32,32], index: 0, kind: input, shape index: {}]   ;;  %s354_s1 = inlined_call_operand.hbm [shape: f32[32,96], index: 1, kind: input, shape index: {}]   ;;  %s355_s2 = inlined_call_operand.hbm [shape: f32[32,96], index: 2, kind: output, shape index: {}]  }
   0x1   :  { %8 = vsyncpa [#allocation6], 0 }
   0x2   :  { %9 = vsyncpa [#allocation4], 0  ;;  %s284_s9 = smov [#allocation2]   ;;  %s212_s13 = scalar_lea.hbm %s353_s0, 512 }
   0x3   :  { %s15_s10 = sshll.u32 %s284_s9, 4  ;;  %p213_p0 = scmp.ne.s32.totalorder %s353_s0, %s212_s13  ;;  %s16_s10 = int_to_ptr.vmem [resolvable:$true] %s15_s10 }
   0x4   :  { %p216_p1 = scmp.lt.u32.totalorder %s212_s13, %s353_s0 }
   0x6   :  { %p218_p2 = pnand %p216_p1, %p213_p0 }
   0x8   :  { %221 = shalt.err (!%p218_p2)
}
   0x9   :  { %s222_s18 = scalar_lea.vmem %s16_s10, 512  ;;  %p227_p4 = scmp.lt.s32.totalorder %s16_s10, %s16_s10 }
   0xa   :  { %p223_p3 = scmp.ne.s32.totalorder %s16_s10, %s222_s18  ;;  %p228_p5 = scmp.lt.s32.totalorder %s222_s18, %s222_s18 }
   0xc   :  { %p229_p6 = por %p228_p5, %p227_p4 }
   0xe   :  { %p230_p7 = pnand %p229_p6, %p223_p3 }
  0x10   :  { %233 = shalt.err (!%p230_p7)
}
  0x11   :  { %s285_s19 = smov 128   ;;  %s286_s20 = smov 8  }
  0x12   :  { %21 = dma.hbm_to_vmem [thread:$0]  %s353_s0, 512, %s16_s10, [#allocation3], %s285_s19, %s285_s19, %s286_s20  }
  0x13   :  { %s287_s23 = smov [#allocation5]   ;;  %s234_s27 = scalar_lea.hbm %s354_s1, 512 }
  0x14   :  { %s27_s24 = sshll.u32 %s287_s23, 4  ;;  %p235_p8 = scmp.ne.s32.totalorder %s354_s1, %s234_s27  ;;  %s28_s24 = int_to_ptr.vmem [resolvable:$true] %s27_s24 }
  0x15   :  { %p238_p9 = scmp.lt.u32.totalorder %s234_s27, %s354_s1 }
  0x17   :  { %p240_p10 = pnand %p238_p9, %p235_p8 }
  0x19   :  { %243 = shalt.err (!%p240_p10)
}
  0x1a   :  { %s244_s4 = scalar_lea.vmem %s28_s24, 512  ;;  %p249_p12 = scmp.lt.s32.totalorder %s28_s24, %s28_s24 }
  0x1b   :  { %p245_p11 = scmp.ne.s32.totalorder %s28_s24, %s244_s4  ;;  %p250_p13 = scmp.lt.s32.totalorder %s244_s4, %s244_s4 }
  0x1d   :  { %p251_p0 = por %p250_p13, %p249_p12 }
  0x1f   :  { %p252_p1 = pnand %p251_p0, %p245_p11 }
  0x21   :  { %255 = shalt.err (!%p252_p1)
}
  0x22   :  { %33 = dma.hbm_to_vmem [thread:$0]  %s354_s1, 512, %s28_s24, [#allocation6], %s285_s19, %s285_s19, %s286_s20  }
  0x23   :  { %278 = dma.done.wait [#allocation3], 512  }
  0x24   :  { %279 = vsyncadd [#allocation3], 4294966784 }
  0x25   :  { %280 = dma.done.wait [#allocation6], 512  }
  0x26   :  { %281 = vsyncadd [#allocation6], 4294966784  ;;  %vm48_vm0 = vcmask 261120   ;;  %v44_v0 = vld [vmem:[#allocation5] sm:$0xff]  ;;  %v45_v1 = vld [vmem:[#allocation5 + $0x8] sm:$0xff]  ;;  %s288_s1 = smov [#allocation7]  }
  0x27   :  { %v46_v2 = vld [vmem:[#allocation5 + $0x10] sm:$0xff]  ;;  %v195_v3 = vpack.c.bf16 %v45_v1, %v44_v0  ;;  %v47_v4 = vld [vmem:[#allocation5 + $0x18] sm:$0xff]  ;;  %v40_v5 = vld [vmem:[#allocation2] sm:$0xff]  ;;  %s156_s6 = sshll.u32 %s288_s1, 4  ;;  %vm146_vm1 = vcmask 785408   ;;  %s157_s6 = int_to_ptr.vmem [resolvable:$true] %s156_s6 }
  0x28   :  { %v42_v6 = vld [vmem:[#allocation2 + $0x10] sm:$0xff]  ;;  %v199_v7 = vpack.c.bf16 %v47_v4, %v46_v2  ;;  %189 = vmatprep.mubr.msk.f32.mxu0 %vm48_vm0, %v40_v5  ;;  %v41_v8 = vld [vmem:[#allocation2 + $0x8] sm:$0xff]  ;;  %v43_v9 = vld [vmem:[#allocation2 + $0x18] sm:$0xff]  ;;  %s256_s7 = scalar_lea.vmem %s157_s6, 512  ;;  %p261_p3 = scmp.lt.s32.totalorder %s157_s6, %s157_s6 }
  0x29   :  { %192 = vmatprep.mubr.msk.f32.mxu1 %vm48_vm0, %v42_v6  ;;  %196 = vmatprep.subr.bf16.mxu0 %v195_v3  ;;  %p257_p2 = scmp.ne.s32.totalorder %s157_s6, %s256_s7  ;;  %p262_p4 = scmp.lt.s32.totalorder %s256_s7, %s256_s7 }
  0x2a   :  { %203 = vmatprep.subr.bf16.mxu1 %v195_v3  ;;  %198 = vmatpush3.bf16.msra.mxu0 %v195_v3 }
  0x2b   :  { %205 = vmatpush3.bf16.msra.mxu1 %v195_v3  ;;  %200 = vmatprep.subr.bf16.mxu0 %v199_v7  ;;  %p263_p5 = por %p262_p4, %p261_p3 }
  0x2c   :  { %204 = vmatprep.subr.bf16.mxu1 %v199_v7 }
  0x2d   :  { %p264_p6 = pnand %p263_p5, %p257_p2 }
  0x2e   :  { %202 = vmatpush3.bf16.msra.mxu0 %v199_v7 }
  0x2f   :  { %206 = vmatpush3.bf16.msra.mxu1 %v199_v7 }
  0x31   :  { %190 = vmatmul.mubr.msk.f32.vlgmr.msra.gmra.mrb[0].mxu0 %vm48_vm0, %v41_v8 }
  0x32   :  { %193 = vmatmul.mubr.msk.f32.vlgmr.msra.gmra.mrb[0].mxu1 %vm48_vm0, %v43_v9 }
 0x104   :  { %v191_v10 = vpop.f32.mrb[0].mxu0 }
 0x105   :  { %v194_v11 = vpop.f32.mrb[0].mxu1  ;;  %148 = vst.msk [vmem:[#allocation7 + $0x8] sm:$0xff] %vm146_vm1, %v191_v10  ;;  %v127_v12 = vpop.f32.mrb[1].mxu0 }
 0x106   :  { %150 = vst.msk [vmem:[#allocation7 + $0x18] sm:$0xff] %vm146_vm1, %v194_v11  ;;  %v137_v13 = vpop.f32.mrb[1].mxu1  ;;  %147 = vst.msk [vmem:[#allocation7] sm:$0xff] %vm146_vm1, %v127_v12 }
 0x107   :  { %149 = vst.msk [vmem:[#allocation7 + $0x10] sm:$0xff] %vm146_vm1, %v137_v13 }
 0x108   :  { %267 = shalt.err (!%p264_p6)
}
 0x109   :  { %s268_s10 = scalar_lea.hbm %s355_s2, 512 }
 0x10a   :  { %p269_p7 = scmp.ne.s32.totalorder %s355_s2, %s268_s10  ;;  %p272_p8 = scmp.lt.u32.totalorder %s268_s10, %s355_s2 }
 0x10c   :  { %p274_p9 = pnand %p272_p8, %p269_p7 }
 0x10e   :  { %277 = shalt.err (!%p274_p9)
}
 0x10f   :  { %162 = dma.vmem_to_hbm [thread:$0]  %s157_s6, 512, %s355_s2, [#allocation4], %s285_s19, %s285_s19, %s286_s20  }
 0x110   :  { %282 = dma.done.wait [#allocation4], 512  }
 0x111   :  { %283 = vsyncadd [#allocation4], 4294966784 }
 0x112   :  { %166 = vsyncpa [#allocation3], 1 }
 0x113   :  { %167 = vsyncpa [#allocation6], 1 }
 0x114   :  { %168 = vsyncpa [#allocation4], 1 }

</bundles_post_ra>
